<compile_context>
chip_gen: v6e
topology: v6e:2x2x1
jax: 0.10.0
libtpu: 0.0.40
codegen_flags: <defaults>
</compile_context>

<pallas_src>
import jax
import jax.numpy as jnp
from jax.experimental import pallas as pl
from jax.experimental.pallas import tpu as pltpu


def _combined_linear_kernel(x_ref, w_ref, b_ref, o_ref):
    # x: (tm, tk, B), w: (tm, tn, tk), b: (tm, tn, 1), o: (tm, tn, B) f32.
    @pl.when(pl.program_id(2) == 0)
    def _init():
        # Resident output block doubles as the f32 accumulator; start it at the
        # bias (lane-broadcast of the size-1 minor dim over the batch axis).
        o_ref[...] = jnp.broadcast_to(b_ref[...], o_ref.shape)

    o_ref[...] += jnp.einsum(
        "moi,mib->mob",
        w_ref[...],
        x_ref[...],
        preferred_element_type=jnp.float32,
    )


def _round_up(x, m):
    return -(-x // m) * m


def _block_vmem_bytes(shape, itemsize):
    """Padded VMEM footprint of one (..., sublane, lane) block."""
    *lead, sub, lane = shape
    sub_mult = max(1, 32 // itemsize)  # 8 for f32, 16 for bf16
    padded = _round_up(sub, sub_mult) * _round_up(lane, 128) * itemsize
    for d in lead:
        padded *= d
    return padded


def _divisors_desc(n):
    return [d for d in range(n, 0, -1) if n % d == 0]


def _dim_candidates(full, unit):
    """Full dim first (always legal), then divisors that are multiples of `unit`."""
    cands = [full]
    for d in _divisors_desc(full):
        if d != full and d % unit == 0:
            cands.append(d)
    return cands


def _vmem_budget():
    """(tile budget bytes, scoped vmem limit bytes), per TPU generation."""
    try:
        cap = int(getattr(pltpu.get_tpu_info(), "vmem_capacity_bytes"))
    except Exception:
        cap = 64 * 1024 * 1024  # conservative (v7x-sized) fallback
    limit = min((cap * 3) // 4, 96 * 1024 * 1024)  # ~96 MiB v5e/v6e, ~48 MiB v7x
    budget = (limit * 3) // 4                      # headroom for compiler scratch
    return budget, limit


def _min_parallel_steps():
    """v7x has 2 TensorCores: keep >= 4 parallel steps so each core still has
    >= 2 to double-buffer.  Single-TC chips may use one big block (tm == M)."""
    try:
        kind = jax.devices()[0].device_kind.lower()
    except Exception:
        kind = ""
    return 4 if "v7" in kind else 1


def _choose_tiles(M, out_f, in_f, B, itemsize, budget_bytes, min_steps):
    """Pick (tm, tn, tk) as exact divisors of (M, out_f, in_f): prefer untiled
    N/K with as many models per block as fit the budget; shrink tn/tk only
    when a single model's operands do not fit (e.g. huge weights on v7x)."""

    def step_bytes(tm, tn, tk):
        # double-buffered x / w / bias blocks + the resident f32 output block
        return 2 * (
            _block_vmem_bytes((tm, tk, B), itemsize)
            + _block_vmem_bytes((tm, tn, tk), itemsize)
            + _block_vmem_bytes((tm, tn, 1), 4)
            + _block_vmem_bytes((tm, tn, B), 4)
        )

    tm_cands = _divisors_desc(M)
    tn_cands = _dim_candidates(out_f, 16)   # 2nd-minor of weight/output blocks
    tk_cands = _dim_candidates(in_f, 128)   # lane dim of weight blocks
    for tk in tk_cands:
        for tn in tn_cands:
            for tm in tm_cands:
                if (M // tm) * (out_f // tn) < min(min_steps, M):
                    continue  # keep enough parallel steps for megacore sharding
                if step_bytes(tm, tn, tk) <= budget_bytes:
                    return tm, tn, tk
    # Nothing fits the budget: fall back to the smallest legal tiles.
    # TODO(synk): also tile the batch axis B for extreme (in_f, out_f, B).
    return 1, tn_cands[-1], tk_cands[-1]


def combined_linear(weight, bias, x, *, compute_dtype=jnp.bfloat16):
    """weight: (M, out, in), bias: (M, out), x: (M, in, B) -> (M, out, B) f32."""
    M, out_f, in_f = weight.shape
    _, _, B = x.shape

    # bf16 operands feed the MXU at native rate and halve HBM/VMEM traffic;
    # accumulation, bias and output stay f32.
    w_c = weight.astype(compute_dtype)            # (M, out, in) - natural layout
    x_c = x.astype(compute_dtype)                 # (M, in,  B)  - natural layout
    b_c = bias.astype(jnp.float32)[:, :, None]    # (M, out, 1)

    budget, vmem_limit = _vmem_budget()
    min_steps = _min_parallel_steps()
    itemsize = jnp.dtype(compute_dtype).itemsize
    tm, tn, tk = _choose_tiles(M, out_f, in_f, B, itemsize, budget, min_steps)

    grid = (M // tm, out_f // tn, in_f // tk)

    return pl.pallas_call(
        _combined_linear_kernel,
        out_shape=jax.ShapeDtypeStruct((M, out_f, B), jnp.float32),
        grid_spec=pltpu.PrefetchScalarGridSpec(
            num_scalar_prefetch=0,
            grid=grid,
            in_specs=[
                pl.BlockSpec((tm, tk, B), lambda m, n, k: (m, k, 0)),
                # TODO(synk): if profiling shows the weight DMA exposed, bump to
                # pipeline_mode=pl.Buffered(3) on this spec only (sweep, don't guess).
                pl.BlockSpec((tm, tn, tk), lambda m, n, k: (m, n, k)),
                pl.BlockSpec((tm, tn, 1), lambda m, n, k: (m, n, 0)),
            ],
            out_specs=pl.BlockSpec((tm, tn, B), lambda m, n, k: (m, n, 0)),
        ),
        compiler_params=pltpu.CompilerParams(
            dimension_semantics=("parallel", "parallel", "arbitrary"),
            vmem_limit_bytes=vmem_limit,
        ),
    )(x_c, w_c, b_c)


if __name__ == "__main__":
    # Small shapes consistent with the module's forward:
    #   weight (M, out, in), bias (M, out), x (M, in, B)
    model_size, in_features, out_features, batch_size = 4, 32, 16, 8

    key = jax.random.PRNGKey(0)
    kw, kb, kx = jax.random.split(key, 3)
    # torch.rand -> uniform [0, 1); replicate deterministically.
    weight = jax.random.uniform(
        kw, (model_size, out_features, in_features), dtype=jnp.float32
    )
    bias = jax.random.uniform(kb, (model_size, out_features), dtype=jnp.float32)
    x = jax.random.uniform(
        kx, (model_size, in_features, batch_size), dtype=jnp.float32
    )

    ref = jnp.matmul(weight, x) + bias[:, :, None]

    # Exact f32 path (semantics parity with the PyTorch module).
    out_f32 = jax.block_until_ready(
        combined_linear(weight, bias, x, compute_dtype=jnp.float32)
    )
    assert out_f32.shape == (model_size, out_features, batch_size)
    assert jnp.allclose(out_f32, ref, atol=1e-5, rtol=1e-5)

    # Default bf16-operand / f32-accumulate path (looser tolerance).
    out_bf16 = jax.block_until_ready(combined_linear(weight, bias, x))
    assert out_bf16.shape == (model_size, out_features, batch_size)
    assert jnp.allclose(out_bf16, ref, atol=3e-2, rtol=3e-2)

    print("KERNEL_OK")
</pallas_src>

<mosaic_0001>
module attributes {stable_mosaic.version = 11 : i64} {
  func.func @_combined_linear_kernel(%arg0: i32, %arg1: i32, %arg2: i32, %arg3: memref<4x32x8xf32, #tpu.memory_space<vmem>>, %arg4: memref<4x16x32xf32, #tpu.memory_space<vmem>>, %arg5: memref<4x16x1xf32, #tpu.memory_space<vmem>>, %arg6: memref<4x16x8xf32, #tpu.memory_space<vmem>>) attributes {dimension_semantics = [#tpu.dimension_semantics<parallel>, #tpu.dimension_semantics<parallel>, #tpu.dimension_semantics<arbitrary>], iteration_bounds = array<i64: 1, 1, 1>, scalar_prefetch = 0 : i64, scratch_operands = 0 : i64, tpu.core_type = #tpu.core_type<tc>, window_params = [{transform_indices = @transform_0, window_bounds = array<i64: 4, 32, 8>}, {transform_indices = @transform_1, window_bounds = array<i64: 4, 16, 32>}, {transform_indices = @transform_2, window_bounds = array<i64: 4, 16, 1>}, {transform_indices = @transform_3, window_bounds = array<i64: 4, 16, 8>}]} {
    %c0_i32 = arith.constant 0 : i32
    %0 = arith.cmpi eq, %arg2, %c0_i32 : i32
    %1 = arith.extui %0 : i1 to i32
    %c0_i32_0 = arith.constant 0 : i32
    %2 = arith.cmpi ne, %1, %c0_i32_0 : i32
    scf.if %2 {
      %c0_12 = arith.constant 0 : index
      %c0_13 = arith.constant 0 : index
      %c0_14 = arith.constant 0 : index
      %9 = vector.load %arg5[%c0_12, %c0_13, %c0_14] : memref<4x16x1xf32, #tpu.memory_space<vmem>>, vector<4x16x1xf32>
      %10 = vector.shape_cast %9 : vector<4x16x1xf32> to vector<4x16x1xf32>
      %11 = vector.broadcast %10 : vector<4x16x1xf32> to vector<4x16x8xf32>
      %c0_15 = arith.constant 0 : index
      %c0_16 = arith.constant 0 : index
      %c0_17 = arith.constant 0 : index
      %12 = vector.load %arg6[%c0_15, %c0_16, %c0_17] : memref<4x16x8xf32, #tpu.memory_space<vmem>>, vector<4x16x8xf32>
      tpu.vector_store %arg6[%c0_15, %c0_16, %c0_17], %11 {strides = array<i32>} : memref<4x16x8xf32, #tpu.memory_space<vmem>>, vector<4x16x8xf32>,
    } else {
    }
    %c0 = arith.constant 0 : index
    %c0_1 = arith.constant 0 : index
    %c0_2 = arith.constant 0 : index
    %3 = vector.load %arg6[%c0, %c0_1, %c0_2] : memref<4x16x8xf32, #tpu.memory_space<vmem>>, vector<4x16x8xf32>
    %c0_3 = arith.constant 0 : index
    %c0_4 = arith.constant 0 : index
    %c0_5 = arith.constant 0 : index
    %4 = vector.load %arg4[%c0_3, %c0_4, %c0_5] : memref<4x16x32xf32, #tpu.memory_space<vmem>>, vector<4x16x32xf32>
    %c0_6 = arith.constant 0 : index
    %c0_7 = arith.constant 0 : index
    %c0_8 = arith.constant 0 : index
    %5 = vector.load %arg3[%c0_6, %c0_7, %c0_8] : memref<4x32x8xf32, #tpu.memory_space<vmem>>, vector<4x32x8xf32>
    "tpu.trace_start"() <{level = 10 : i32, message = "moi,mib->mob"}> : () -> ()
    %cst = arith.constant dense<0.000000e+00> : vector<4x16x8xf32>
    %6 = tpu.matmul %4, %5, %cst {dimension_numbers = #tpu.dot_dimension_numbers<[2], [1], [1], [2], [0, 0, 0, 1, 1, 2], [0], [0]>} : vector<4x16x32xf32>, vector<4x32x8xf32>, vector<4x16x8xf32> -> vector<4x16x8xf32>
    "tpu.trace_stop"() : () -> ()
    %7 = arith.addf %3, %6 : vector<4x16x8xf32>
    %c0_9 = arith.constant 0 : index
    %c0_10 = arith.constant 0 : index
    %c0_11 = arith.constant 0 : index
    %8 = vector.load %arg6[%c0_9, %c0_10, %c0_11] : memref<4x16x8xf32, #tpu.memory_space<vmem>>, vector<4x16x8xf32>
    tpu.vector_store %arg6[%c0_9, %c0_10, %c0_11], %7 {strides = array<i32>} : memref<4x16x8xf32, #tpu.memory_space<vmem>>, vector<4x16x8xf32>,
    return
  }
  func.func @transform_0(%arg0: i32, %arg1: i32, %arg2: i32) -> (i32, i32, i32) {
    %c0_i32 = arith.constant 0 : i32
    %c0_i32_0 = arith.constant 0 : i32
    return %arg0, %arg2, %c0_i32 : i32, i32, i32
  }
  func.func @transform_1(%arg0: i32, %arg1: i32, %arg2: i32) -> (i32, i32, i32) {
    %c0_i32 = arith.constant 0 : i32
    return %arg0, %arg1, %arg2 : i32, i32, i32
  }
  func.func @transform_2(%arg0: i32, %arg1: i32, %arg2: i32) -> (i32, i32, i32) {
    %c0_i32 = arith.constant 0 : i32
    %c0_i32_0 = arith.constant 0 : i32
    return %arg0, %arg1, %c0_i32 : i32, i32, i32
  }
  func.func @transform_3(%arg0: i32, %arg1: i32, %arg2: i32) -> (i32, i32, i32) {
    %c0_i32 = arith.constant 0 : i32
    %c0_i32_0 = arith.constant 0 : i32
    return %arg0, %arg1, %c0_i32 : i32, i32, i32
  }
}

</mosaic_0001>

<bundles_post_ra>
// kernel: tpu_custom_call.1
= control target key start
LH: loop header
LB: loop body
LE: loop exit
PB: predicated region body
PF: predicated region fallthrough
CT: control target
= control target key end

     0   :  { %v532_v3 = vmov 0   ;;  %vm107_vm0 = vcmask 261120   ;;  %vm66_vm1 = vcmask 64512   ;;  %s745_s0 = inlined_call_operand.vmem [shape: f32[4,32,8], index: 0, kind: input, shape index: {}]   ;;  %s746_s1 = inlined_call_operand.vmem [shape: f32[4,16,32], index: 1, kind: input, shape index: {}]   ;;  %s747_s2 = inlined_call_operand.vmem [shape: f32[4,16,1], index: 2, kind: input, shape index: {}]   ;;  %s748_s3 = inlined_call_operand.vmem [shape: f32[4,16,8], index: 3, kind: output, shape index: {}]  }
   0x1   :  { %v94_v0 = vld [vmem:[%s745_s0 + $0x18] sm:$0xff]  ;;  %v93_v2 = vld [vmem:[%s745_s0 + $0x10] sm:$0xff]  ;;  %531 = vset.pattern.permute.xlu1 %v532_v3  ;;  %530 = vset.pattern.permute.xlu0 %v532_v3  ;;  %v92_v5 = vld [vmem:[%s745_s0 + $0x8] sm:$0xff] }
   0x2   :  { %v98_v1 = vld [vmem:[%s745_s0 + $0x38] sm:$0xff]  ;;  %485 = vmatprep.subr.mxu0 %v94_v0  ;;  %v97_v4 = vld [vmem:[%s745_s0 + $0x30] sm:$0xff]  ;;  %v96_v6 = vld [vmem:[%s745_s0 + $0x28] sm:$0xff] }
   0x3   :  { %496 = vmatprep.subr.mxu1 %v98_v1  ;;  %486 = vmatpush3.msra.mxu0 %v94_v0  ;;  %v91_v7 = vld [vmem:[%s745_s0] sm:$0xff]  ;;  %v85_v10 = vld [vmem:[%s746_s1 + $0x10] sm:$0xff]  ;;  %v84_v11 = vld [vmem:[%s746_s1 + $0x8] sm:$0xff] }
   0x4   :  { %497 = vmatpush3.msra.mxu1 %v98_v1  ;;  %487 = vmatprep.subr.mxu0 %v93_v2  ;;  %v95_v8 = vld [vmem:[%s745_s0 + $0x20] sm:$0xff]  ;;  %v86_v12 = vld [vmem:[%s746_s1 + $0x18] sm:$0xff]  ;;  %v101_v15 = vld [vmem:[%s745_s0 + $0x50] sm:$0xff] }
   0x5   :  { %498 = vmatprep.subr.mxu1 %v97_v4  ;;  %488 = vmatpush3.msra.mxu0 %v93_v2  ;;  %v83_v9 = vld [vmem:[%s746_s1] sm:$0xff]  ;;  %v102_v13 = vld [vmem:[%s745_s0 + $0x58] sm:$0xff]  ;;  %v105_v16 = vld [vmem:[%s745_s0 + $0x70] sm:$0xff] }
   0x6   :  { %499 = vmatpush3.msra.mxu1 %v97_v4  ;;  %489 = vmatprep.subr.mxu0 %v92_v5  ;;  %v106_v14 = vld [vmem:[%s745_s0 + $0x78] sm:$0xff]  ;;  %v100_v17 = vld [vmem:[%s745_s0 + $0x48] sm:$0xff]  ;;  %v99_v19 = vld [vmem:[%s745_s0 + $0x40] sm:$0xff] }
   0x7   :  { %500 = vmatprep.subr.mxu1 %v96_v6  ;;  %490 = vmatpush3.msra.mxu0 %v92_v5  ;;  %v104_v18 = vld [vmem:[%s745_s0 + $0x68] sm:$0xff]  ;;  %v103_v20 = vld [vmem:[%s745_s0 + $0x60] sm:$0xff]  ;;  %v89_v22 = vld [vmem:[%s746_s1 + $0x30] sm:$0xff] }
   0x8   :  { %501 = vmatpush3.msra.mxu1 %v96_v6  ;;  %491 = vmatprep.subr.mxu0 %v91_v7  ;;  %v87_v21 = vld [vmem:[%s746_s1 + $0x20] sm:$0xff]  ;;  %v88_v23 = vld [vmem:[%s746_s1 + $0x28] sm:$0xff]  ;;  %v90_v24 = vld [vmem:[%s746_s1 + $0x38] sm:$0xff] }
   0x9   :  { %502 = vmatprep.subr.mxu1 %v95_v8  ;;  %492 = vmatpush3.msra.mxu0 %v91_v7  ;;  %v20_v25 = vld [vmem:[%s747_s2 + $0x10] sm:$0xff]  ;;  %v18_v26 = vld [vmem:[%s747_s2] sm:$0xff]  ;;  %v21_v27 = vld [vmem:[%s747_s2 + $0x18] sm:$0xff] }
   0xa   :  { %493 = vmatprep.mubr.msk.f32.mxu0 %vm107_vm0, %v83_v9  ;;  %503 = vmatpush3.msra.mxu1 %v95_v8  ;;  %v19_v28 = vld [vmem:[%s747_s2 + $0x8] sm:$0xff]  ;;  %v22_v30 = vld [vmem:[%s747_s2 + $0x20] sm:$0xff]  ;;  %v25_v31 = vld [vmem:[%s747_s2 + $0x38] sm:$0xff] }
   0xb   :  { %504 = vmatprep.mubr.msk.f32.mxu1 %vm107_vm0, %v85_v10  ;;  %494 = vmatmul.mubr.msk.f32.vlgmr.msra.gmra.mxu0 %vm107_vm0, %v84_v11  ;;  %v23_v29 = vld [vmem:[%s747_s2 + $0x28] sm:$0xff]  ;;  %v24_v32 = vld [vmem:[%s747_s2 + $0x30] sm:$0xff] }
   0xc   :  { %505 = vmatmul.mubr.msk.f32.vlgmr.msra.gmra.mxu1 %vm107_vm0, %v86_v12  ;;  %507 = vmatprep.subr.mxu0 %v102_v13 }
   0xd   :  { %518 = vmatprep.subr.mxu1 %v106_v14  ;;  %508 = vmatpush3.msra.mxu0 %v102_v13 }
   0xe   :  { %519 = vmatpush3.msra.mxu1 %v106_v14  ;;  %509 = vmatprep.subr.mxu0 %v101_v15 }
   0xf   :  { %520 = vmatprep.subr.mxu1 %v105_v16  ;;  %510 = vmatpush3.msra.mxu0 %v101_v15 }
  0x10   :  { %521 = vmatpush3.msra.mxu1 %v105_v16  ;;  %511 = vmatprep.subr.mxu0 %v100_v17 }
  0x11   :  { %522 = vmatprep.subr.mxu1 %v104_v18  ;;  %512 = vmatpush3.msra.mxu0 %v100_v17 }
  0x12   :  { %523 = vmatpush3.msra.mxu1 %v104_v18  ;;  %513 = vmatprep.subr.mxu0 %v99_v19 }
  0x13   :  { %524 = vmatprep.subr.mxu1 %v103_v20  ;;  %514 = vmatpush3.msra.mxu0 %v99_v19 }
  0x14   :  { %515 = vmatprep.mubr.msk.f32.mxu0 %vm107_vm0, %v87_v21  ;;  %525 = vmatpush3.msra.mxu1 %v103_v20 }
  0x15   :  { %526 = vmatprep.mubr.msk.f32.mxu1 %vm107_vm0, %v89_v22  ;;  %516 = vmatmul.mubr.msk.f32.vlgmr.msra.gmra.mxu0 %vm107_vm0, %v88_v23 }
  0x16   :  { %527 = vmatmul.mubr.msk.f32.vlgmr.msra.gmra.mxu1 %vm107_vm0, %v90_v24  ;;  %38 = vperm.xlu1 %531, %v20_v25  }
  0x17   :  { %28 = vperm.xlu0 %530, %v18_v26  }
  0x1a   :  { %43 = vperm.xlu1 %531, %v21_v27  }
  0x1b   :  { %33 = vperm.xlu0 %530, %v19_v28  }
  0x1e   :  { %53 = vperm.xlu1 %531, %v23_v29  }
  0x1f   :  { %48 = vperm.xlu0 %530, %v22_v30  }
  0x22   :  { %63 = vperm.xlu1 %531, %v25_v31  }
  0x23   :  { %58 = vperm.xlu0 %530, %v24_v32  }
  0x91   :  { %v39_v33 = vpop.permute.xlu1 %38 }
  0x92   :  { %v29_v34 = vpop.permute.xlu0 %28  ;;  %69 = vst.msk [vmem:[%s748_s3 + $0x10] sm:$0xff] %vm66_vm1, %v39_v33 }
  0x93   :  { %67 = vst.msk [vmem:[%s748_s3] sm:$0xff] %vm66_vm1, %v29_v34 }
  0x95   :  { %v44_v35 = vpop.permute.xlu1 %43 }
  0x96   :  { %v34_v36 = vpop.permute.xlu0 %33  ;;  %70 = vst.msk [vmem:[%s748_s3 + $0x18] sm:$0xff] %vm66_vm1, %v44_v35 }
  0x97   :  { %68 = vst.msk [vmem:[%s748_s3 + $0x8] sm:$0xff] %vm66_vm1, %v34_v36 }
  0x99   :  { %v54_v37 = vpop.permute.xlu1 %53  ;;  %v77_v49 = vld [vmem:[%s748_s3 + $0x10] sm:$0xff] }
  0x9a   :  { %v49_v38 = vpop.permute.xlu0 %48  ;;  %72 = vst.msk [vmem:[%s748_s3 + $0x28] sm:$0xff] %vm66_vm1, %v54_v37  ;;  %v75_v47 = vld [vmem:[%s748_s3] sm:$0xff] }
  0x9b   :  { %71 = vst.msk [vmem:[%s748_s3 + $0x20] sm:$0xff] %vm66_vm1, %v49_v38 }
  0x9d   :  { %v64_v39 = vpop.permute.xlu1 %63  ;;  %v78_v43 = vld [vmem:[%s748_s3 + $0x18] sm:$0xff] }
  0x9e   :  { %v59_v40 = vpop.permute.xlu0 %58  ;;  %74 = vst.msk [vmem:[%s748_s3 + $0x38] sm:$0xff] %vm66_vm1, %v64_v39  ;;  %v76_v41 = vld [vmem:[%s748_s3 + $0x8] sm:$0xff] }
  0x9f   :  { %73 = vst.msk [vmem:[%s748_s3 + $0x30] sm:$0xff] %vm66_vm1, %v59_v40 }
  0xa1   :  { %v80_v53 = vld [vmem:[%s748_s3 + $0x28] sm:$0xff] }
  0xa2   :  { %v79_v59 = vld [vmem:[%s748_s3 + $0x20] sm:$0xff] }
  0xa5   :  { %v82_v55 = vld [vmem:[%s748_s3 + $0x38] sm:$0xff] }
  0xa6   :  { %v81_v61 = vld [vmem:[%s748_s3 + $0x30] sm:$0xff] }
  0xcb   :  { %v495_v42 = vpop.f32.mrf.mxu0 }
  0xcc   :  { %v506_v44 = vpop.f32.mrf.mxu1  ;;  %v433_v45 = vadd.f32 %v495_v42, %v76_v41 }
  0xcd   :  { %v435_v46 = vadd.f32 %v506_v44, %v78_v43  ;;  %v180_v48 = vpop.f32.mrf.mxu0 }
  0xce   :  { %v261_v50 = vpop.f32.mrf.mxu1  ;;  %442 = vst.msk [vmem:[%s748_s3 + $0x8] sm:$0xff] %vm66_vm1, %v433_v45  ;;  %v432_v51 = vadd.f32 %v180_v48, %v75_v47 }
  0xcf   :  { %444 = vst.msk [vmem:[%s748_s3 + $0x18] sm:$0xff] %vm66_vm1, %v435_v46  ;;  %v434_v52 = vadd.f32 %v261_v50, %v77_v49 }
  0xd0   :  { %441 = vst.msk [vmem:[%s748_s3] sm:$0xff] %vm66_vm1, %v432_v51 }
  0xd1   :  { %443 = vst.msk [vmem:[%s748_s3 + $0x10] sm:$0xff] %vm66_vm1, %v434_v52 }
  0xd5   :  { %v517_v54 = vpop.f32.mrf.mxu0 }
  0xd6   :  { %v528_v56 = vpop.f32.mrf.mxu1  ;;  %v437_v57 = vadd.f32 %v517_v54, %v80_v53 }
  0xd7   :  { %v439_v58 = vadd.f32 %v528_v56, %v82_v55  ;;  %v342_v60 = vpop.f32.mrf.mxu0 }
  0xd8   :  { %v423_v62 = vpop.f32.mrf.mxu1  ;;  %446 = vst.msk [vmem:[%s748_s3 + $0x28] sm:$0xff] %vm66_vm1, %v437_v57  ;;  %v436_v63 = vadd.f32 %v342_v60, %v79_v59 }
  0xd9   :  { %448 = vst.msk [vmem:[%s748_s3 + $0x38] sm:$0xff] %vm66_vm1, %v439_v58  ;;  %v438_v0 = vadd.f32 %v423_v62, %v81_v61 }
  0xda   :  { %445 = vst.msk [vmem:[%s748_s3 + $0x20] sm:$0xff] %vm66_vm1, %v436_v63 }
  0xdb   :  { %447 = vst.msk [vmem:[%s748_s3 + $0x30] sm:$0xff] %vm66_vm1, %v438_v0 }

</bundles_post_ra>
